<compile_context>
chip_gen: v7x
topology: tpu7x:2x2x1
jax: 0.10.0
libtpu: 0.0.40
codegen_flags: <defaults>
</compile_context>

<pallas_src>
import math
from functools import partial

import jax
import jax.numpy as jnp
import numpy as np
from jax.experimental import pallas as pl
from jax.experimental.pallas import tpu as pltpu


def _round_up(x: int, m: int) -> int:
    return ((x + m - 1) // m) * m


# ----------------------------------------------------------------------------
# Kernel
# ----------------------------------------------------------------------------
def _pos_emb_kernel(freqs_ref, off_ref, tokens_ref, out_ref, *,
                    padding_idx: int, left_pad: bool, embedding_dim: int):
    """One (batch block, seq tile):
         freqs  (1, 1, half) f32   -- constant-index input (fetched once)
         off    (BB, 1, 1)  int32  -- left-pad position offset per batch row
         tokens (BB, TS, 1) int32
         out    (BB, TS, D) f32
    """
    s = pl.program_id(1)                               # seq tile index
    bb, ts, _ = out_ref.shape
    half = embedding_dim // 2

    tokens = tokens_ref[...]                           # (BB, TS, 1)
    mask = tokens != padding_idx                       # (BB, TS, 1)

    # positions begin at padding_idx + 1; this tile covers rows [s*TS, (s+1)*TS)
    col = (jax.lax.broadcasted_iota(jnp.int32, (1, ts, 1), 1)
           + s * ts + (padding_idx + 1))               # (1, TS, 1)
    if left_pad:
        # per-row offset: positions -= S - (# non-pad tokens in the row)
        base = col + off_ref[...]                      # (BB, TS, 1)
    else:
        base = col                                     # (1, TS, 1): shared by all BB rows

    args = base.astype(jnp.float32) * freqs_ref[...]   # (1|BB, TS, half)
    sin_v = jnp.sin(args)
    cos_v = jnp.cos(args)

    # Pad tokens select the zeroed padding_idx row of the original table.
    # Store each half directly into its lane slice (no concatenate / extra copy).
    out_ref[:, :, :half] = jnp.where(mask, sin_v, 0.0)
    out_ref[:, :, half:2 * half] = jnp.where(mask, cos_v, 0.0)
    if embedding_dim % 2 == 1:
        out_ref[:, :, 2 * half:] = jnp.zeros((bb, ts, 1), jnp.float32)


# ----------------------------------------------------------------------------
# Tile selection (VMEM-aware, generation-aware)
# ----------------------------------------------------------------------------
def _vmem_limit_bytes() -> int:
    try:
        cap = int(pltpu.get_tpu_info().vmem_capacity_bytes)
    except Exception:
        cap = 64 * 1024 * 1024                 # conservative (v7x per-TC)
    # leave headroom for compiler scratch; ~48 MiB on v7x, ~96 MiB on v5e/v6e
    return min((cap * 3) // 4, 100 * 1024 * 1024)


def _choose_tiles(B: int, S: int, D: int, vmem_limit: int):
    """Pick (batch block BB, seq tile TS) from a per-step VMEM byte budget."""
    half = max(D // 2, 1)

    def cost(bb, ts):
        out_blk = 2 * bb * ts * D * 4          # double-buffered output block
        tmp = 3 * bb * ts * half * 4           # args / sin / cos live temporaries
        tok = 2 * bb * ts * 128 * 4            # (bb,ts,1) int32 lane-padded, 2 bufs
        return out_blk + tmp + tok + (1 << 16)

    budget = int(vmem_limit * 0.7)
    s_cap = _round_up(S, 8)
    for ts in (512, 256, 128, 64, 32, 16, 8):  # large seq tiles first (~85% roofline)
        if ts > s_cap:
            continue
        for bb in (8, 4, 2, 1):                # then amortize across batch rows
            if bb > B:
                continue
            if cost(bb, ts) <= budget:
                return bb, ts
    return 1, 8


# ----------------------------------------------------------------------------
# Wrapper
# ----------------------------------------------------------------------------
def sinusoidal_positional_embedding(tokens: jax.Array,
                                    embedding_dim: int,
                                    padding_idx: int,
                                    left_pad: bool) -> jax.Array:
    """tokens: [B, S] int -> [B, S, embedding_dim] float32."""
    B, S = tokens.shape
    tokens = tokens.astype(jnp.int32)
    half = embedding_dim // 2
    assert half >= 1, "embedding_dim must be >= 2"

    vmem_limit = _vmem_limit_bytes()
    BB, TS = _choose_tiles(B, S, embedding_dim, vmem_limit)
    B_pad, S_pad = _round_up(B, BB), _round_up(S, TS)

    # Ragged shapes: pad with padding_idx tokens (those rows are masked to zero
    # in-kernel) and slice the output back; avoids tiny-tile fallback.
    if (B_pad, S_pad) != (B, S):
        tok_p = jnp.full((B_pad, S_pad), padding_idx, jnp.int32).at[:B, :S].set(tokens)
    else:
        tok_p = tokens

    # left_pad offset per row (computed on the original, unpadded tokens).
    if left_pad:
        nonpad = jnp.sum((tokens != padding_idx).astype(jnp.int32), axis=1)  # (B,)
        off = nonpad - S
    else:
        off = jnp.zeros((B,), jnp.int32)
    off_p = jnp.zeros((B_pad,), jnp.int32).at[:B].set(off).reshape(B_pad, 1, 1)

    # Inverse frequencies: computed once here, constant-index input in-kernel.
    # TODO(synk): half == 1 (D in {2, 3}) is degenerate in the fairseq formula
    #             (division by half-1 -> inf/NaN); we use scale = 0 instead.
    scale = (math.log(10000.0) / (half - 1)) if half > 1 else 0.0
    freqs = jnp.exp(jnp.arange(half, dtype=jnp.float32) * -scale).reshape(1, 1, half)

    tok3 = tok_p.reshape(B_pad, S_pad, 1)
    n_b, n_s = B_pad // BB, S_pad // TS

    kernel = partial(_pos_emb_kernel, padding_idx=padding_idx,
                     left_pad=left_pad, embedding_dim=embedding_dim)

    out = pl.pallas_call(
        kernel,
        out_shape=jax.ShapeDtypeStruct((B_pad, S_pad, embedding_dim), jnp.float32),
        grid=(n_b, n_s),
        in_specs=[
            pl.BlockSpec((1, 1, half), lambda b, s: (0, 0, 0)),   # freqs (constant idx)
            pl.BlockSpec((BB, 1, 1), lambda b, s: (b, 0, 0)),     # per-row offsets
            pl.BlockSpec((BB, TS, 1), lambda b, s: (b, s, 0)),    # tokens
        ],
        out_specs=pl.BlockSpec((BB, TS, embedding_dim), lambda b, s: (b, s, 0)),
        compiler_params=pltpu.CompilerParams(
            dimension_semantics=("parallel", "parallel"),
            vmem_limit_bytes=vmem_limit,
        ),
    )(freqs, off_p, tok3)

    if (B_pad, S_pad) != (B, S):
        out = out[:B, :S]
    return out


# ----------------------------------------------------------------------------
# Pure-JAX reference (mirrors the PyTorch module: table build + gather)
# ----------------------------------------------------------------------------
def get_sinusoidal_embedding(num_embeddings, embedding_dim, padding_idx=None):
    half_dim = embedding_dim // 2
    scale = math.log(10000.0) / (half_dim - 1)
    freqs = jnp.exp(jnp.arange(half_dim, dtype=jnp.float32) * -scale)
    args = jnp.arange(num_embeddings, dtype=jnp.float32)[:, None] * freqs[None, :]
    emb = jnp.concatenate([jnp.sin(args), jnp.cos(args)], axis=1)
    if embedding_dim % 2 == 1:
        emb = jnp.concatenate([emb, jnp.zeros((num_embeddings, 1), jnp.float32)], axis=1)
    if padding_idx is not None:
        emb = emb.at[padding_idx, :].set(0.0)
    return emb


def _reference(tokens, embedding_dim, padding_idx, left_pad):
    B, S = tokens.shape
    max_pos = padding_idx + 1 + S
    weights = get_sinusoidal_embedding(max_pos, embedding_dim, padding_idx)
    mask = tokens != padding_idx
    base = jnp.arange(padding_idx + 1, padding_idx + 1 + S, dtype=jnp.int32)[None, :]
    base = jnp.broadcast_to(base, (B, S))
    if left_pad:
        base = base - S + jnp.sum(mask.astype(jnp.int32), axis=1, keepdims=True)
    positions = jnp.where(mask, base, padding_idx)
    return weights[positions.reshape(-1)].reshape(B, S, embedding_dim)


# ----------------------------------------------------------------------------
# Test
# ----------------------------------------------------------------------------
if __name__ == "__main__":
    padding_idx = 1
    key = jax.random.PRNGKey(0)

    # Case 1: B=2, S=8, D=32 (exact tiles, batch block BB=2)
    bsz, seq_len, embedding_dim = 2, 8, 32
    tokens = jax.random.randint(key, (bsz, seq_len), minval=2, maxval=100,
                                dtype=jnp.int32)
    tok_right = tokens.at[0, 6:].set(padding_idx).at[1, 4:].set(padding_idx)
    tok_left = tokens.at[0, :2].set(padding_idx).at[1, :4].set(padding_idx)

    out_r = jax.block_until_ready(
        sinusoidal_positional_embedding(tok_right, embedding_dim, padding_idx, False))
    out_l = jax.block_until_ready(
        sinusoidal_positional_embedding(tok_left, embedding_dim, padding_idx, True))
    assert out_r.shape == (bsz, seq_len, embedding_dim) and out_r.dtype == jnp.float32
    assert out_l.shape == (bsz, seq_len, embedding_dim) and out_l.dtype == jnp.float32
    np.testing.assert_allclose(np.asarray(out_r),
                               np.asarray(_reference(tok_right, embedding_dim, padding_idx, False)),
                               rtol=1e-5, atol=1e-5)
    np.testing.assert_allclose(np.asarray(out_l),
                               np.asarray(_reference(tok_left, embedding_dim, padding_idx, True)),
                               rtol=1e-5, atol=1e-5)

    # Case 2: ragged B=3, S=12 (exercises pad-to-tile + output slice path)
    b2, s2, d2 = 3, 12, 32
    tok2 = jax.random.randint(jax.random.PRNGKey(1), (b2, s2), minval=2, maxval=100,
                              dtype=jnp.int32)
    tok2_r = tok2.at[0, 9:].set(padding_idx).at[2, 5:].set(padding_idx)
    tok2_l = tok2.at[0, :3].set(padding_idx).at[2, :7].set(padding_idx)

    out2_r = jax.block_until_ready(
        sinusoidal_positional_embedding(tok2_r, d2, padding_idx, False))
    out2_l = jax.block_until_ready(
        sinusoidal_positional_embedding(tok2_l, d2, padding_idx, True))
    assert out2_r.shape == (b2, s2, d2) and out2_l.shape == (b2, s2, d2)
    np.testing.assert_allclose(np.asarray(out2_r),
                               np.asarray(_reference(tok2_r, d2, padding_idx, False)),
                               rtol=1e-5, atol=1e-5)
    np.testing.assert_allclose(np.asarray(out2_l),
                               np.asarray(_reference(tok2_l, d2, padding_idx, True)),
                               rtol=1e-5, atol=1e-5)

    print("KERNEL_OK")
</pallas_src>

<mosaic_0001>
module attributes {stable_mosaic.version = 11 : i64} {
  func.func @_pos_emb_kernel(%arg0: i32, %arg1: i32, %arg2: memref<1x1x16xf32, #tpu.memory_space<vmem>>, %arg3: memref<2x1x1xi32, #tpu.memory_space<vmem>>, %arg4: memref<2x8x1xi32, #tpu.memory_space<vmem>>, %arg5: memref<2x8x32xf32, #tpu.memory_space<vmem>>) attributes {dimension_semantics = [#tpu.dimension_semantics<parallel>, #tpu.dimension_semantics<parallel>], iteration_bounds = array<i64: 1, 1>, scalar_prefetch = 0 : i64, scratch_operands = 0 : i64, tpu.core_type = #tpu.core_type<tc>, window_params = [{pipeline_mode = #tpu.pipeline_mode<synchronous>, transform_indices = @transform_0, window_bounds = array<i64: 1, 1, 16>}, {transform_indices = @transform_1, window_bounds = array<i64: 2, 1, 1>}, {transform_indices = @transform_2, window_bounds = array<i64: 2, 8, 1>}, {transform_indices = @transform_3, window_bounds = array<i64: 2, 8, 32>}]} {
    %c0 = arith.constant 0 : index
    %c0_0 = arith.constant 0 : index
    %c0_1 = arith.constant 0 : index
    %0 = vector.load %arg4[%c0, %c0_0, %c0_1] : memref<2x8x1xi32, #tpu.memory_space<vmem>>, vector<2x8x1xi32>
    %c1_i32 = arith.constant 1 : i32
    %1 = vector.broadcast %c1_i32 : i32 to vector<2x8x1xi32>
    %2 = arith.cmpi ne, %0, %1 : vector<2x8x1xi32>
    %3 = tpu.iota {dimensions = array<i32: 1>} : vector<1x8x1xi32>
    %c8_i32 = arith.constant 8 : i32
    %4 = arith.muli %arg1, %c8_i32 : i32
    %5 = vector.broadcast %4 : i32 to vector<1x8x1xi32>
    %6 = arith.addi %3, %5 : vector<1x8x1xi32>
    %c2_i32 = arith.constant 2 : i32
    %7 = vector.broadcast %c2_i32 : i32 to vector<1x8x1xi32>
    %8 = arith.addi %6, %7 : vector<1x8x1xi32>
    %9 = arith.sitofp %8 : vector<1x8x1xi32> to vector<1x8x1xf32>
    %c0_2 = arith.constant 0 : index
    %c0_3 = arith.constant 0 : index
    %c0_4 = arith.constant 0 : index
    %10 = vector.load %arg2[%c0_2, %c0_3, %c0_4] : memref<1x1x16xf32, #tpu.memory_space<vmem>>, vector<1x1x16xf32>
    %11 = vector.broadcast %9 : vector<1x8x1xf32> to vector<1x8x16xf32>
    %12 = vector.broadcast %10 : vector<1x1x16xf32> to vector<1x8x16xf32>
    %13 = arith.mulf %11, %12 : vector<1x8x16xf32>
    %14 = math.sin %13 : vector<1x8x16xf32>
    %15 = math.cos %13 : vector<1x8x16xf32>
    %cst = arith.constant 0.000000e+00 : f32
    %16 = vector.shape_cast %2 : vector<2x8x1xi1> to vector<2x8x1xi1>
    %17 = vector.broadcast %16 : vector<2x8x1xi1> to vector<2x8x16xi1>
    %18 = vector.shape_cast %14 : vector<1x8x16xf32> to vector<1x8x16xf32>
    %19 = vector.broadcast %18 : vector<1x8x16xf32> to vector<2x8x16xf32>
    %20 = vector.broadcast %cst : f32 to vector<2x8x16xf32>
    %21 = arith.select %17, %19, %20 : vector<2x8x16xi1>, vector<2x8x16xf32>
    %c0_5 = arith.constant 0 : index
    %c0_6 = arith.constant 0 : index
    %c0_7 = arith.constant 0 : index
    %22 = vector.load %arg5[%c0_5, %c0_6, %c0_7] : memref<2x8x32xf32, #tpu.memory_space<vmem>>, vector<2x8x16xf32>
    tpu.vector_store %arg5[%c0_5, %c0_6, %c0_7], %21 {strides = array<i32>} : memref<2x8x32xf32, #tpu.memory_space<vmem>>, vector<2x8x16xf32>,
    %cst_8 = arith.constant 0.000000e+00 : f32
    %23 = vector.shape_cast %2 : vector<2x8x1xi1> to vector<2x8x1xi1>
    %24 = vector.broadcast %23 : vector<2x8x1xi1> to vector<2x8x16xi1>
    %25 = vector.shape_cast %15 : vector<1x8x16xf32> to vector<1x8x16xf32>
    %26 = vector.broadcast %25 : vector<1x8x16xf32> to vector<2x8x16xf32>
    %27 = vector.broadcast %cst_8 : f32 to vector<2x8x16xf32>
    %28 = arith.select %24, %26, %27 : vector<2x8x16xi1>, vector<2x8x16xf32>
    %c0_9 = arith.constant 0 : index
    %c0_10 = arith.constant 0 : index
    %c16 = arith.constant 16 : index
    %29 = vector.load %arg5[%c0_9, %c0_10, %c16] : memref<2x8x32xf32, #tpu.memory_space<vmem>>, vector<2x8x16xf32>
    tpu.vector_store %arg5[%c0_9, %c0_10, %c16], %28 {strides = array<i32>} : memref<2x8x32xf32, #tpu.memory_space<vmem>>, vector<2x8x16xf32>,
    return
  }
  func.func @transform_0(%arg0: i32, %arg1: i32) -> (i32, i32, i32) {
    %c0_i32 = arith.constant 0 : i32
    %c0_i32_0 = arith.constant 0 : i32
    %c0_i32_1 = arith.constant 0 : i32
    %c0_i32_2 = arith.constant 0 : i32
    return %c0_i32, %c0_i32_0, %c0_i32_1 : i32, i32, i32
  }
  func.func @transform_1(%arg0: i32, %arg1: i32) -> (i32, i32, i32) {
    %c0_i32 = arith.constant 0 : i32
    %c0_i32_0 = arith.constant 0 : i32
    %c0_i32_1 = arith.constant 0 : i32
    return %arg0, %c0_i32, %c0_i32_0 : i32, i32, i32
  }
  func.func @transform_2(%arg0: i32, %arg1: i32) -> (i32, i32, i32) {
    %c0_i32 = arith.constant 0 : i32
    %c0_i32_0 = arith.constant 0 : i32
    return %arg0, %arg1, %c0_i32 : i32, i32, i32
  }
  func.func @transform_3(%arg0: i32, %arg1: i32) -> (i32, i32, i32) {
    %c0_i32 = arith.constant 0 : i32
    %c0_i32_0 = arith.constant 0 : i32
    return %arg0, %arg1, %c0_i32 : i32, i32, i32
  }
}

</mosaic_0001>

<bundles_post_ra>
// kernel: tpu_custom_call.1
= control target key start
LH: loop header
LB: loop body
LE: loop exit
PB: predicated region body
PF: predicated region fallthrough
CT: control target
= control target key end

     0   :  { %v19_v2 = vlaneseq  ;;  %v338_v3 = vmov 0   ;;  %s411_s0 = inlined_call_operand.vmem [shape: f32[1,1,16], index: 0, kind: input, shape index: {}]   ;;  %s412_s1 = inlined_call_operand.vmem [shape: s32[2,1,1], index: 1, kind: input, shape index: {}]   ;;  %s413_s2 = inlined_call_operand.vmem [shape: s32[2,8,1], index: 2, kind: input, shape index: {}]   ;;  %s414_s3 = inlined_call_operand.hbm [shape: f32[2,8,32], index: 3, kind: output, shape index: {}]  }
   0x1   :  { %v15_v0 = vld [vmem:[%s413_s2] sm:$0xff]  ;;  %v16_v1 = vld [vmem:[%s413_s2 + $0x8] sm:$0xff]  ;;  %309 = vset.pattern.permute.xlu0 %v338_v3 }
   0x2   :  { %vm17_vm0 = vcmp.ne.s32.totalorder %v15_v0, 1  ;;  %vm18_vm1 = vcmp.ne.s32.totalorder %v16_v1, 1  ;;  %v20_v5 = vshrl.u32 %v19_v2, 7 }
   0x3   :  { %v241_v4 = vsel %vm17_vm0, 1, %v338_v3  ;;  %v242_v6 = vsel %vm18_vm1, 1, %v338_v3 }
   0x4   :  { %244 = vperm.xlu0 %309, %v241_v4   ;;  %v24_v7 = vadd.s32 2, %v20_v5 }
   0x5   :  { %8 = vsyncpa [#allocation3], 0  ;;  %v285_v8 = vld [vmem:[%s411_s0] ss:$0 sm:$0xff]  ;;  %v339_v22 = vmov 683565275  }
   0x6   :  { %v25_v9 = vcvt.s32.f32 %v24_v7  ;;  %v340_v24 = vmov 2475754826   ;;  %v341_v26 = vmov 2131351028   ;;  %v342_v28 = vmov 2102212464  }
   0x7   :  { %v343_v30 = vmov 920167782   ;;  %v344_v37 = vmov 1326507024   ;;  %s345_s0 = smov 16   ;;  %s346_s2 = smov [#allocation2]  }
   0x8   :  { %247 = vperm.xlu0 %309, %v242_v6   ;;  %v378_v10 = vmul.f32 %v285_v8, %v25_v9  ;;  %s274_s17 = sshll.u32 %s346_s2, 4  ;;  %s275_s17 = int_to_ptr.vmem [resolvable:$true] %s274_s17 }
   0x9   :  { %s314_s18 = scalar_lea.vmem %s275_s17, 256  ;;  %p319_p1 = scmp.lt.s32.totalorder %s275_s17, %s275_s17 }
   0xa   :  { %v37_v11 = vand.u32 2139095040, %v378_v10  ;;  %v34_v13 = vand.u32 2147483647, %v378_v10  ;;  %vm36_vm9 = vcmp.lt.s32.totalorder %v378_v10, 0  ;;  %vm126_vm1 = vweird.f32 %v378_v10  ;;  %p315_p0 = scmp.ne.s32.totalorder %s275_s17, %s314_s18  ;;  %p320_p2 = scmp.lt.s32.totalorder %s314_s18, %s314_s18 }
   0xc   :  { %v38_v12 = vshrl.u32 %v37_v11, 23  ;;  %v41_v16 = vand.u32 8388607, %v34_v13  ;;  %vm35_vm10 = vcmp.le.f32.partialorder %v34_v13, 0.7853982  ;;  %p321_p3 = por %p320_p2, %p319_p1 }
   0xe   :  { %v286_v14 = vadd.s32 4294967169, %v38_v12  ;;  %v42_v19 = vor.u32 8388608, %v41_v16  ;;  %p322_p4 = pnand %p321_p3, %p315_p0 }
  0x10   :  { %v44_v15 = vadd.s32 1, %v286_v14  ;;  %v82_v39 = vshll.u32 %v42_v19, 8 }
  0x12   :  { %vm45_vm2 = vcmp.gt.s32.totalorder %v44_v15, 0 }
  0x13   :  { %v46_v17 = vsel %vm45_vm2, %v44_v15, 0  ;;  %vm253_vm2 = vcmask 130048  }
  0x14   :  { %v48_v18 = vand.u32 31, %v46_v17  ;;  %v47_v20 = vshrl.u32 %v46_v17, 5 }
  0x16   :  { %v49_v21 = vsub.s32 32, %v48_v18  ;;  %v51_v23 = vshll.u32 %v339_v22, %v48_v18  ;;  %v54_v25 = vshll.u32 %v340_v24, %v48_v18  ;;  %v57_v27 = vshll.u32 %v341_v26, %v48_v18 }
  0x17   :  { %v60_v29 = vshll.u32 %v342_v28, %v48_v18  ;;  %v63_v31 = vshll.u32 %v343_v30, %v48_v18  ;;  %vm66_vm3 = vcmp.lt.s32.totalorder %v47_v20, 1  ;;  %vm69_vm4 = vcmp.lt.s32.totalorder %v47_v20, 4 }
  0x18   :  { %v50_v32 = vshrl.u32 %v339_v22, %v49_v21  ;;  %v52_v33 = vshrl.u32 %v340_v24, %v49_v21  ;;  %v55_v34 = vshrl.u32 %v341_v26, %v49_v21  ;;  %v58_v35 = vshrl.u32 %v342_v28, %v49_v21 }
  0x19   :  { %v61_v36 = vshrl.u32 %v343_v30, %v49_v21  ;;  %v64_v38 = vshrl.u32 %v344_v37, %v49_v21  ;;  %vm67_vm5 = vcmp.lt.s32.totalorder %v47_v20, 2  ;;  %vm68_vm6 = vcmp.lt.s32.totalorder %v47_v20, 3 }
  0x1a   :  { %v53_v40 = vor.u32 %v52_v33, %v51_v23  ;;  %v56_v41 = vor.u32 %v55_v34, %v54_v25  ;;  %v59_v42 = vor.u32 %v58_v35, %v57_v27 }
  0x1b   :  { %v62_v43 = vor.u32 %v61_v36, %v60_v29  ;;  %v65_v44 = vor.u32 %v64_v38, %v63_v31 }
  0x1c   :  { %v70_v45 = vsel %vm66_vm3, %v50_v32, %v53_v40  ;;  %v71_v46 = vsel %vm69_vm4, %v59_v42, 2102212464  ;;  %v74_v47 = vsel %vm66_vm3, %v53_v40, %v56_v41  ;;  %v78_v48 = vsel %vm66_vm3, %v56_v41, %v59_v42 }
  0x1d   :  { %v72_v49 = vsel %vm68_vm6, %v56_v41, %v71_v46  ;;  %v75_v50 = vsel %vm69_vm4, %v62_v43, 920167782  ;;  %v79_v51 = vsel %vm69_vm4, %v65_v44, 1326507024 }
  0x1e   :  { %v76_v52 = vsel %vm68_vm6, %v59_v42, %v75_v50  ;;  %v80_v53 = vsel %vm68_vm6, %v62_v43, %v79_v51  ;;  %v73_v54 = vsel %vm67_vm5, %v70_v45, %v72_v49 }
  0x1f   :  { %v77_v55 = vsel %vm67_vm5, %v74_v47, %v76_v52  ;;  %v81_v56 = vsel %vm67_vm5, %v78_v48, %v80_v53  ;;  %v89_v61 = vmul.u32 %v82_v39, %v73_v54  ;;  %vm266_vm5 = vcmask 261248  }
  0x20   :  { %v384_v57 = vmul.u32.u64.low %v82_v39, %v81_v56  ;;  %v385_v58 = vmul.u32.u64.high %v82_v39, %v81_v56, %v384_v57  ;;  %v387_v59 = vmul.u32.u64.low %v82_v39, %v77_v55  ;;  %v388_v60 = vmul.u32.u64.high %v82_v39, %v77_v55, %v387_v59 }
  0x22   :  { %vm91_vm7 = vc.u32 %v385_v58, %v387_v59  ;;  %v92_v62 = vadd.s32 1, %v388_v60  ;;  %v90_v12 = vadd.s32 %v387_v59, %v385_v58 }
  0x24   :  { %v93_v63 = vsel %vm91_vm7, %v92_v62, %v388_v60 }
  0x25   :  { %v94_v0 = vadd.s32 %v93_v63, %v89_v61 }
  0x27   :  { %v95_v1 = vadd.s32 536870912, %v94_v0 }
  0x29   :  { %v96_v2 = vshrl.u32 %v95_v1, 30 }
  0x2b   :  { %v97_v3 = vshll.u32 %v96_v2, 30  ;;  %v120_v26 = vsub.s32 4, %v96_v2 }
  0x2d   :  { %v98_v4 = vsub.s32 %v94_v0, %v97_v3  ;;  %v121_v28 = vsel %vm36_vm9, %v120_v26, %v96_v2 }
  0x2e   :  { %v123_v29 = vsel %vm35_vm10, 0, %v121_v28 }
  0x2f   :  { %v100_v5 = vsub.s32 0, %v98_v4  ;;  %v127_v30 = vadd.s32 3, %v123_v29  ;;  %v231_v34 = vand.u32 3, %v123_v29 }
  0x31   :  { %v287_v6 = vmin.u32 %v100_v5, %v98_v4  ;;  %v128_v33 = vand.u32 3, %v127_v30  ;;  %vm233_vm13 = vcmp.eq.s32.totalorder %v231_v34, 0  ;;  %vm236_vm14 = vcmp.eq.s32.totalorder %v231_v34, 2 }
  0x32   :  { %vm232_vm0 = vcmp.lt.s32.totalorder %v231_v34, 2 }
  0x33   :  { %v102_v7 = vclz %v287_v6  ;;  %vm130_vm11 = vcmp.eq.s32.totalorder %v128_v33, 0  ;;  %vm133_vm12 = vcmp.eq.s32.totalorder %v128_v33, 2  ;;  %vm129_vm15 = vcmp.lt.s32.totalorder %v128_v33, 2 }
  0x35   :  { %v288_v8 = vadd.s32 4294967294, %v102_v7 }
  0x37   :  { %vm289_vm8 = vcmp.lt.s32.totalorder %v288_v8, 0 }
  0x38   :  { %v105_v9 = vsel %vm289_vm8, 0, %v288_v8 }
  0x39   :  { %v110_v11 = vsub.s32 4294967266, %v105_v9  ;;  %v106_v14 = vsub.s32 32, %v105_v9  ;;  %v107_v16 = vshll.u32 %v98_v4, %v105_v9 }
  0x3b   :  { %v111_v15 = vadd.s32 127, %v110_v11  ;;  %v108_v17 = vshrl.u32 %v90_v12, %v106_v14 }
  0x3d   :  { %v112_v18 = vshll.u32 %v111_v15, 23  ;;  %v109_v19 = vor.u32 %v108_v17, %v107_v16 }
  0x3f   :  { %v113_v20 = vor.u32 4788187, %v112_v18  ;;  %v116_v22 = vcvt.s32.f32 %v109_v19 }
  0x41   :  { %v114_v21 = vand.u32 2147483647, %v113_v20 }
  0x43   :  { %v117_v23 = vmul.f32 %v116_v22, %v114_v21 }
  0x45   :  { %v118_v24 = vxor.u32 2147483648, %v117_v23 }
  0x47   :  { %v119_v25 = vsel %vm36_vm9, %v118_v24, %v117_v23 }
  0x48   :  { %v122_v27 = vsel %vm35_vm10, %v378_v10, %v119_v25 }
  0x49   :  { %310 = vcosq.f32 %v122_v27 }
  0x4a   :  { %312 = vsinq.f32 %v122_v27 }
  0x53   :  { %v311_v31 = vpop.eup %310 }
  0x54   :  { %v313_v32 = vpop.eup %312  ;;  %v134_v36 = vxor.u32 2147483648, %v311_v31 }
  0x55   :  { %v131_v35 = vxor.u32 2147483648, %v313_v32 }
  0x56   :  { %v135_v37 = vsel %vm133_vm12, %v134_v36, %v313_v32  ;;  %v238_v39 = vsel %vm236_vm14, %v134_v36, %v313_v32 }
  0x57   :  { %v132_v13 = vsel %vm130_vm11, %v311_v31, %v131_v35  ;;  %v235_v38 = vsel %vm233_vm13, %v311_v31, %v131_v35 }
  0x58   :  { %v136_v40 = vsel %vm129_vm15, %v132_v13, %v135_v37  ;;  %v239_v41 = vsel %vm232_vm0, %v235_v38, %v238_v39 }
  0x59   :  { %v137_v42 = vsel %vm126_vm1, nan, %v136_v40  ;;  %v240_v43 = vsel %vm126_vm1, nan, %v239_v41 }
  0x83   :  { %v245_v44 = vpop.permute.xlu0 %244 }
  0x84   :  { %vm249_vm3 = vcmp.eq.s32.totalorder %v245_v44, 1 }
  0x85   :  { %v251_v45 = vsel %vm249_vm3, %v137_v42, 0.0  ;;  %v256_v46 = vsel %vm249_vm3, %v240_v43, 0.0 }
  0x86   :  { %254 = vst.msk [vmem:[#allocation2] sm:$0xff] %vm253_vm2, %v251_v45  ;;  %260 = vrot.lane.b32.xlu1 %v256_v46, %s345_s0 }
  0x87   :  { %v248_v47 = vpop.permute.xlu0 %247 }
  0x88   :  { %vm250_vm4 = vcmp.eq.s32.totalorder %v248_v47, 1 }
  0x89   :  { %v252_v48 = vsel %vm250_vm4, %v137_v42, 0.0  ;;  %v257_v49 = vsel %vm250_vm4, %v240_v43, 0.0 }
  0x8a   :  { %255 = vst.msk [vmem:[#allocation2 + $0x8] sm:$0xff] %vm253_vm2, %v252_v48  ;;  %262 = vrot.lane.b32.xlu1 %v257_v49, %s345_s0 }
  0xf8   :  { %v261_v10 = vpop.permute.xlu1 %260 }
  0xf9   :  { %267 = vst.msk [vmem:[#allocation2] sm:$0xff] %vm266_vm5, %v261_v10 }
  0xfc   :  { %v263_v50 = vpop.permute.xlu1 %262 }
  0xfd   :  { %268 = vst.msk [vmem:[#allocation2 + $0x8] sm:$0xff] %vm266_vm5, %v263_v50 }
  0xfe   :  { %325 = shalt.err (!%p322_p4)
}
  0xff   :  { %s326_s21 = scalar_lea.hbm %s414_s3, 256 }
 0x100   :  { %p327_p5 = scmp.ne.s32.totalorder %s414_s3, %s326_s21  ;;  %p330_p6 = scmp.lt.u32.totalorder %s326_s21, %s414_s3 }
 0x102   :  { %p332_p7 = pnand %p330_p6, %p327_p5 }
 0x104   :  { %335 = shalt.err (!%p332_p7)
}
 0x105   :  { %s347_s26 = smov 128   ;;  %s348_s27 = smov 8  }
 0x106   :  { %280 = dma.vmem_to_hbm [thread:$0]  %s275_s17, 256, %s414_s3, [#allocation3], %s347_s26, %s347_s26, %s348_s27  }
 0x107   :  { %336 = dma.done.wait [#allocation3], 256  }
 0x108   :  { %337 = vsyncadd [#allocation3], 4294967040 }
 0x109   :  { %284 = vsyncpa [#allocation3], 1 }

</bundles_post_ra>
